<compile_context>
chip_gen: v6e
topology: v6e:2x2x1
jax: 0.10.0
libtpu: 0.0.40
codegen_flags: <defaults>
</compile_context>

<pallas_src>
import functools

import jax
import jax.numpy as jnp
from jax.experimental import pallas as pl
from jax.experimental.pallas import tpu as pltpu


def _round_up(x, m):
    return ((x + m - 1) // m) * m


def _lstm_fc_kernel(gx_ref, whh_ref, wfc_ref, bfc_ref, out_ref,
                    *, seq_len, hidden_size):
    """LSTM recurrence (input projection pre-folded) + final FC.

    gx_ref  : (T, Bp, Gp) f32  precomputed x_t @ W_ih^T + (b_ih + b_hh),
                               gates packed [i|f|g|o] in the first 4H lanes
    whh_ref : (Gp, Gp)    bf16 W_hh^T, rows [0,H) real, cols packed [i|f|g|o]
    wfc_ref : (Gp, Cp)    f32  W_fc^T, rows [0,H) real
    bfc_ref : (1, Cp)     f32
    out_ref : (Bp, Cp)    f32
    """
    H = hidden_size
    _, Bp, Gp = gx_ref.shape

    w_hh = whh_ref[...]                                    # resident bf16 weight

    lane = jax.lax.broadcasted_iota(jnp.int32, (Bp, Gp), 1)
    is_g = (lane >= 2 * H) & (lane < 3 * H)                # tanh-gate lanes
    keep_h = lane < H                                      # real state lanes

    h0 = jnp.zeros((Bp, Gp), jnp.float32)
    c0 = jnp.zeros((Bp, Gp), jnp.float32)

    def step(t, carry):
        h, c = carry
        # Single (Bp,Gp)x(Gp,Gp) bf16 MXU matmul per step, f32 accumulation.
        gates = gx_ref[t] + jnp.dot(h.astype(jnp.bfloat16), w_hh,
                                    preferred_element_type=jnp.float32)
        # One EUP tanh for all four gates: sigmoid(x) = 0.5*tanh(0.5*x) + 0.5.
        pre = jnp.where(is_g, gates, 0.5 * gates)
        th = jnp.tanh(pre)
        act = jnp.where(is_g, th, 0.5 * th + 0.5)          # [i|f|g|o] packed
        # Align f, g, o with the state lanes [0,H); XLU rotates, off VPU path.
        f_al = pltpu.roll(act, Gp - H, 1)                  # f -> lanes [0,H)
        g_al = pltpu.roll(act, Gp - 2 * H, 1)              # g -> lanes [0,H)
        o_al = pltpu.roll(act, Gp - 3 * H, 1)              # o -> lanes [0,H)
        # Padded lanes are forced to exactly 0 so they never leak via W_hh.
        c_new = jnp.where(keep_h, f_al * c + act * g_al, 0.0)
        h_new = jnp.where(keep_h, o_al * jnp.tanh(c_new), 0.0)
        return h_new, c_new

    h_last, _ = jax.lax.fori_loop(
        0, seq_len, step, (h0, c0),
        unroll=seq_len if seq_len <= 32 else 8)

    # Classifier on the last hidden state (== output[:, -1, :] in PyTorch).
    out_ref[...] = (jnp.dot(h_last, wfc_ref[...],
                            preferred_element_type=jnp.float32)
                    + bfc_ref[...])


def comments_classifier_forward(input_ids, params):
    """JAX wrapper reproducing Comments_Classifier.forward."""
    emb = params["embedding"]          # (V, E), row 0 zeroed (padding_idx=0)
    w_ih = params["w_ih"]              # (4H, E)  PyTorch layout, gates [i,f,g,o]
    w_hh = params["w_hh"]              # (4H, H)
    b_ih = params["b_ih"]              # (4H,)
    b_hh = params["b_hh"]              # (4H,)
    w_fc = params["w_fc"]              # (C, H)
    b_fc = params["b_fc"]              # (C,)

    B, T = input_ids.shape
    H = w_hh.shape[1]
    C = w_fc.shape[0]
    G = 4 * H

    Bp = _round_up(B, 8)
    Gp = _round_up(G, 128)             # packed gate lanes ([i|f|g|o] contiguous)
    Cp = _round_up(C, 128)

    # ---- Input projection hoisted out of the recurrence (projected table). --
    # table[v] = emb[v] @ W_ih^T + (b_ih + b_hh).  Row 0 (padding_idx) becomes
    # exactly the bias, which is what the LSTM computes for a zero embedding,
    # so forward semantics are unchanged.
    table = (jnp.dot(emb.astype(jnp.float32), w_ih.T.astype(jnp.float32))
             + (b_ih + b_hh).astype(jnp.float32))          # (V, 4H)
    gx = jnp.take(table, input_ids, axis=0)                # (B, T, 4H)
    gx = jnp.transpose(gx, (1, 0, 2))                      # (T, B, 4H) time-major
    gx_pad = jnp.zeros((T, Bp, Gp), jnp.float32)
    gx_pad = gx_pad.at[:, :B, :G].set(gx)

    # ---- Recurrent weight: packed gate columns, padded to (Gp, Gp), bf16. ---
    whh_p = jnp.zeros((Gp, Gp), jnp.float32)
    whh_p = whh_p.at[:H, :G].set(w_hh.T.astype(jnp.float32)).astype(jnp.bfloat16)

    # ---- Classifier weights (f32: runs once, keep full precision). ---------
    wfc_p = jnp.zeros((Gp, Cp), jnp.float32).at[:H, :C].set(
        w_fc.T.astype(jnp.float32))
    bfc_p = jnp.zeros((1, Cp), jnp.float32).at[0, :C].set(
        b_fc.astype(jnp.float32))

    # VMEM budget guard for the fully-resident time-major gate sequence
    # (v7x scoped default is 32 MiB, v5e default 16 MiB).
    resident_bytes = (gx_pad.size * 4 + whh_p.size * 2 + wfc_p.size * 4
                      + bfc_p.size * 4 + Bp * Cp * 4)
    assert resident_bytes < 16 * 1024 * 1024, resident_bytes

    kernel = functools.partial(_lstm_fc_kernel, seq_len=T, hidden_size=H)

    out = pl.pallas_call(
        kernel,
        out_shape=jax.ShapeDtypeStruct((Bp, Cp), jnp.float32),
        in_specs=[
            pl.BlockSpec(memory_space=pltpu.MemorySpace.VMEM),   # gx (T,Bp,Gp)
            pl.BlockSpec(memory_space=pltpu.MemorySpace.VMEM),   # W_hh^T packed
            pl.BlockSpec(memory_space=pltpu.MemorySpace.VMEM),   # W_fc^T
            pl.BlockSpec(memory_space=pltpu.MemorySpace.VMEM),   # b_fc
        ],
        out_specs=pl.BlockSpec(memory_space=pltpu.MemorySpace.VMEM),
        compiler_params=pltpu.CompilerParams(
            vmem_limit_bytes=32 * 1024 * 1024),
    )(gx_pad, whh_p, wfc_p, bfc_p)

    return out[:B, :C]


def _reference_forward(input_ids, params):
    """Pure-JAX reference mirroring the kernel's numerics recipe
    (f32 input projection / FC, bf16 operands for the recurrent matmul)."""
    emb = params["embedding"]
    H = params["w_hh"].shape[1]
    w_ih_t = params["w_ih"].T.astype(jnp.float32)      # (E, 4H)
    w_hh_t = params["w_hh"].T.astype(jnp.bfloat16)     # (H, 4H)
    b = (params["b_ih"] + params["b_hh"]).astype(jnp.float32)
    w_fc_t = params["w_fc"].T.astype(jnp.float32)      # (H, C)
    b_fc = params["b_fc"].astype(jnp.float32)

    x = jnp.take(emb, input_ids, axis=0).astype(jnp.float32)   # (B, T, E)
    B, T, _ = x.shape
    h = jnp.zeros((B, H), jnp.float32)
    c = jnp.zeros((B, H), jnp.float32)
    for t in range(T):
        g = (jnp.dot(x[:, t, :], w_ih_t) + b
             + jnp.dot(h.astype(jnp.bfloat16), w_hh_t,
                       preferred_element_type=jnp.float32))
        i_g = jax.nn.sigmoid(g[:, 0 * H:1 * H])
        f_g = jax.nn.sigmoid(g[:, 1 * H:2 * H])
        g_g = jnp.tanh(g[:, 2 * H:3 * H])
        o_g = jax.nn.sigmoid(g[:, 3 * H:4 * H])
        c = f_g * c + i_g * g_g
        h = o_g * jnp.tanh(c)
    return jnp.dot(h, w_fc_t) + b_fc


def init_params(key, vocab_size, embedding_dim, hidden_size, num_classes):
    """Deterministic synthetic parameters matching the PyTorch module shapes."""
    ks = jax.random.split(key, 7)
    H = hidden_size
    bound = 1.0 / jnp.sqrt(jnp.float32(H))

    embedding = jax.random.normal(ks[0], (vocab_size, embedding_dim),
                                  dtype=jnp.float32)
    embedding = embedding.at[0].set(0.0)   # padding_idx=0

    def uni(k, shape):
        return jax.random.uniform(k, shape, jnp.float32, -bound, bound)

    return {
        "embedding": embedding,
        "w_ih": uni(ks[1], (4 * H, embedding_dim)),
        "w_hh": uni(ks[2], (4 * H, H)),
        "b_ih": uni(ks[3], (4 * H,)),
        "b_hh": uni(ks[4], (4 * H,)),
        "w_fc": uni(ks[5], (num_classes, H)),
        "b_fc": uni(ks[6], (num_classes,)),
    }


if __name__ == "__main__":
    vocab_size, embedding_dim, hidden_size, num_classes = 50, 16, 32, 2
    batch, seq_len = 2, 8

    key = jax.random.PRNGKey(0)
    k_params, k_ids = jax.random.split(key)

    params = init_params(k_params, vocab_size, embedding_dim,
                         hidden_size, num_classes)
    input_ids = jax.random.randint(k_ids, (batch, seq_len), 0, vocab_size,
                                   dtype=jnp.int32)

    logits = comments_classifier_forward(input_ids, params)
    jax.block_until_ready(logits)

    assert logits.shape == (batch, num_classes)
    assert bool(jnp.all(jnp.isfinite(logits)))

    ref = _reference_forward(input_ids, params)
    max_err = float(jnp.max(jnp.abs(logits - ref)))
    assert max_err < 2e-2, f"kernel vs reference mismatch: {max_err}"

    print("KERNEL_OK")
</pallas_src>

<mosaic_0001>
module attributes {stable_mosaic.version = 11 : i64} {
  func.func @_lstm_fc_kernel(%arg0: memref<8x8x128xf32, #tpu.memory_space<vmem>>, %arg1: memref<128x128xbf16, #tpu.memory_space<vmem>>, %arg2: memref<128x128xf32, #tpu.memory_space<vmem>>, %arg3: memref<1x128xf32, #tpu.memory_space<vmem>>, %arg4: memref<8x128xf32, #tpu.memory_space<vmem>>) attributes {dimension_semantics = [], scalar_prefetch = 0 : i64, scratch_operands = 0 : i64, tpu.core_type = #tpu.core_type<tc>} {
    %c0 = arith.constant 0 : index
    %c0_0 = arith.constant 0 : index
    %0 = vector.load %arg1[%c0, %c0_0] : memref<128x128xbf16, #tpu.memory_space<vmem>>, vector<128x128xbf16>
    %1 = tpu.iota {dimensions = array<i32: 1>} : vector<8x128xi32>
    %c64_i32 = arith.constant 64 : i32
    %2 = vector.broadcast %c64_i32 : i32 to vector<8x128xi32>
    %3 = arith.cmpi sge, %1, %2 : vector<8x128xi32>
    %c96_i32 = arith.constant 96 : i32
    %4 = vector.broadcast %c96_i32 : i32 to vector<8x128xi32>
    %5 = arith.cmpi slt, %1, %4 : vector<8x128xi32>
    %6 = arith.andi %3, %5 : vector<8x128xi1>
    %c32_i32 = arith.constant 32 : i32
    %7 = vector.broadcast %c32_i32 : i32 to vector<8x128xi32>
    %8 = arith.cmpi slt, %1, %7 : vector<8x128xi32>
    %cst = arith.constant 0.000000e+00 : f32
    %9 = vector.broadcast %cst : f32 to vector<8x128xf32>
    %cst_1 = arith.constant 0.000000e+00 : f32
    %10 = vector.broadcast %cst_1 : f32 to vector<8x128xf32>
    %c0_i32 = arith.constant 0 : i32
    %11 = arith.index_cast %c0_i32 : i32 to index
    %c0_2 = arith.constant 0 : index
    %c0_3 = arith.constant 0 : index
    %12 = vector.load %arg0[%11, %c0_2, %c0_3] : memref<8x8x128xf32, #tpu.memory_space<vmem>>, vector<1x8x128xf32>
    %13 = vector.shape_cast %12 : vector<1x8x128xf32> to vector<8x128xf32>
    %14 = arith.truncf %9 : vector<8x128xf32> to vector<8x128xbf16>
    %cst_4 = arith.constant dense<0.000000e+00> : vector<8x128xf32>
    %15 = tpu.matmul %14, %0, %cst_4 {dimension_numbers = #tpu.dot_dimension_numbers<[1], [0], [0], [1], [0, 0, 1, 1], [], []>} : vector<8x128xbf16>, vector<128x128xbf16>, vector<8x128xf32> -> vector<8x128xf32>
    %16 = arith.addf %13, %15 : vector<8x128xf32>
    %cst_5 = arith.constant 5.000000e-01 : f32
    %17 = vector.broadcast %cst_5 : f32 to vector<8x128xf32>
    %18 = arith.mulf %17, %16 : vector<8x128xf32>
    %19 = arith.select %6, %16, %18 : vector<8x128xi1>, vector<8x128xf32>
    %20 = math.tanh %19 : vector<8x128xf32>
    %cst_6 = arith.constant 5.000000e-01 : f32
    %21 = vector.broadcast %cst_6 : f32 to vector<8x128xf32>
    %22 = arith.mulf %21, %20 : vector<8x128xf32>
    %cst_7 = arith.constant 5.000000e-01 : f32
    %23 = vector.broadcast %cst_7 : f32 to vector<8x128xf32>
    %24 = arith.addf %22, %23 : vector<8x128xf32>
    %25 = arith.select %6, %20, %24 : vector<8x128xi1>, vector<8x128xf32>
    %c96_i32_8 = arith.constant 96 : i32
    %26 = tpu.dynamic_rotate %25 by %c96_i32_8 dim 1 : vector<8x128xf32>, i32 -> vector<8x128xf32>
    %c64_i32_9 = arith.constant 64 : i32
    %27 = tpu.dynamic_rotate %25 by %c64_i32_9 dim 1 : vector<8x128xf32>, i32 -> vector<8x128xf32>
    %c32_i32_10 = arith.constant 32 : i32
    %28 = tpu.dynamic_rotate %25 by %c32_i32_10 dim 1 : vector<8x128xf32>, i32 -> vector<8x128xf32>
    %29 = arith.mulf %26, %10 : vector<8x128xf32>
    %30 = arith.mulf %25, %27 : vector<8x128xf32>
    %31 = arith.addf %29, %30 : vector<8x128xf32>
    %cst_11 = arith.constant 0.000000e+00 : f32
    %32 = vector.broadcast %cst_11 : f32 to vector<8x128xf32>
    %33 = arith.select %8, %31, %32 : vector<8x128xi1>, vector<8x128xf32>
    %34 = math.tanh %33 : vector<8x128xf32>
    %35 = arith.mulf %28, %34 : vector<8x128xf32>
    %cst_12 = arith.constant 0.000000e+00 : f32
    %36 = vector.broadcast %cst_12 : f32 to vector<8x128xf32>
    %37 = arith.select %8, %35, %36 : vector<8x128xi1>, vector<8x128xf32>
    %c1_i32 = arith.constant 1 : i32
    %38 = arith.index_cast %c1_i32 : i32 to index
    %c0_13 = arith.constant 0 : index
    %c0_14 = arith.constant 0 : index
    %39 = vector.load %arg0[%38, %c0_13, %c0_14] : memref<8x8x128xf32, #tpu.memory_space<vmem>>, vector<1x8x128xf32>
    %40 = vector.shape_cast %39 : vector<1x8x128xf32> to vector<8x128xf32>
    %41 = arith.truncf %37 : vector<8x128xf32> to vector<8x128xbf16>
    %cst_15 = arith.constant dense<0.000000e+00> : vector<8x128xf32>
    %42 = tpu.matmul %41, %0, %cst_15 {dimension_numbers = #tpu.dot_dimension_numbers<[1], [0], [0], [1], [0, 0, 1, 1], [], []>} : vector<8x128xbf16>, vector<128x128xbf16>, vector<8x128xf32> -> vector<8x128xf32>
    %43 = arith.addf %40, %42 : vector<8x128xf32>
    %cst_16 = arith.constant 5.000000e-01 : f32
    %44 = vector.broadcast %cst_16 : f32 to vector<8x128xf32>
    %45 = arith.mulf %44, %43 : vector<8x128xf32>
    %46 = arith.select %6, %43, %45 : vector<8x128xi1>, vector<8x128xf32>
    %47 = math.tanh %46 : vector<8x128xf32>
    %cst_17 = arith.constant 5.000000e-01 : f32
    %48 = vector.broadcast %cst_17 : f32 to vector<8x128xf32>
    %49 = arith.mulf %48, %47 : vector<8x128xf32>
    %cst_18 = arith.constant 5.000000e-01 : f32
    %50 = vector.broadcast %cst_18 : f32 to vector<8x128xf32>
    %51 = arith.addf %49, %50 : vector<8x128xf32>
    %52 = arith.select %6, %47, %51 : vector<8x128xi1>, vector<8x128xf32>
    %c96_i32_19 = arith.constant 96 : i32
    %53 = tpu.dynamic_rotate %52 by %c96_i32_19 dim 1 : vector<8x128xf32>, i32 -> vector<8x128xf32>
    %c64_i32_20 = arith.constant 64 : i32
    %54 = tpu.dynamic_rotate %52 by %c64_i32_20 dim 1 : vector<8x128xf32>, i32 -> vector<8x128xf32>
    %c32_i32_21 = arith.constant 32 : i32
    %55 = tpu.dynamic_rotate %52 by %c32_i32_21 dim 1 : vector<8x128xf32>, i32 -> vector<8x128xf32>
    %56 = arith.mulf %53, %33 : vector<8x128xf32>
    %57 = arith.mulf %52, %54 : vector<8x128xf32>
    %58 = arith.addf %56, %57 : vector<8x128xf32>
    %cst_22 = arith.constant 0.000000e+00 : f32
    %59 = vector.broadcast %cst_22 : f32 to vector<8x128xf32>
    %60 = arith.select %8, %58, %59 : vector<8x128xi1>, vector<8x128xf32>
    %61 = math.tanh %60 : vector<8x128xf32>
    %62 = arith.mulf %55, %61 : vector<8x128xf32>
    %cst_23 = arith.constant 0.000000e+00 : f32
    %63 = vector.broadcast %cst_23 : f32 to vector<8x128xf32>
    %64 = arith.select %8, %62, %63 : vector<8x128xi1>, vector<8x128xf32>
    %c2_i32 = arith.constant 2 : i32
    %65 = arith.index_cast %c2_i32 : i32 to index
    %c0_24 = arith.constant 0 : index
    %c0_25 = arith.constant 0 : index
    %66 = vector.load %arg0[%65, %c0_24, %c0_25] : memref<8x8x128xf32, #tpu.memory_space<vmem>>, vector<1x8x128xf32>
    %67 = vector.shape_cast %66 : vector<1x8x128xf32> to vector<8x128xf32>
    %68 = arith.truncf %64 : vector<8x128xf32> to vector<8x128xbf16>
    %cst_26 = arith.constant dense<0.000000e+00> : vector<8x128xf32>
    %69 = tpu.matmul %68, %0, %cst_26 {dimension_numbers = #tpu.dot_dimension_numbers<[1], [0], [0], [1], [0, 0, 1, 1], [], []>} : vector<8x128xbf16>, vector<128x128xbf16>, vector<8x128xf32> -> vector<8x128xf32>
    %70 = arith.addf %67, %69 : vector<8x128xf32>
    %cst_27 = arith.constant 5.000000e-01 : f32
    %71 = vector.broadcast %cst_27 : f32 to vector<8x128xf32>
    %72 = arith.mulf %71, %70 : vector<8x128xf32>
    %73 = arith.select %6, %70, %72 : vector<8x128xi1>, vector<8x128xf32>
    %74 = math.tanh %73 : vector<8x128xf32>
    %cst_28 = arith.constant 5.000000e-01 : f32
    %75 = vector.broadcast %cst_28 : f32 to vector<8x128xf32>
    %76 = arith.mulf %75, %74 : vector<8x128xf32>
    %cst_29 = arith.constant 5.000000e-01 : f32
    %77 = vector.broadcast %cst_29 : f32 to vector<8x128xf32>
    %78 = arith.addf %76, %77 : vector<8x128xf32>
    %79 = arith.select %6, %74, %78 : vector<8x128xi1>, vector<8x128xf32>
    %c96_i32_30 = arith.constant 96 : i32
    %80 = tpu.dynamic_rotate %79 by %c96_i32_30 dim 1 : vector<8x128xf32>, i32 -> vector<8x128xf32>
    %c64_i32_31 = arith.constant 64 : i32
    %81 = tpu.dynamic_rotate %79 by %c64_i32_31 dim 1 : vector<8x128xf32>, i32 -> vector<8x128xf32>
    %c32_i32_32 = arith.constant 32 : i32
    %82 = tpu.dynamic_rotate %79 by %c32_i32_32 dim 1 : vector<8x128xf32>, i32 -> vector<8x128xf32>
    %83 = arith.mulf %80, %60 : vector<8x128xf32>
    %84 = arith.mulf %79, %81 : vector<8x128xf32>
    %85 = arith.addf %83, %84 : vector<8x128xf32>
    %cst_33 = arith.constant 0.000000e+00 : f32
    %86 = vector.broadcast %cst_33 : f32 to vector<8x128xf32>
    %87 = arith.select %8, %85, %86 : vector<8x128xi1>, vector<8x128xf32>
    %88 = math.tanh %87 : vector<8x128xf32>
    %89 = arith.mulf %82, %88 : vector<8x128xf32>
    %cst_34 = arith.constant 0.000000e+00 : f32
    %90 = vector.broadcast %cst_34 : f32 to vector<8x128xf32>
    %91 = arith.select %8, %89, %90 : vector<8x128xi1>, vector<8x128xf32>
    %c3_i32 = arith.constant 3 : i32
    %92 = arith.index_cast %c3_i32 : i32 to index
    %c0_35 = arith.constant 0 : index
    %c0_36 = arith.constant 0 : index
    %93 = vector.load %arg0[%92, %c0_35, %c0_36] : memref<8x8x128xf32, #tpu.memory_space<vmem>>, vector<1x8x128xf32>
    %94 = vector.shape_cast %93 : vector<1x8x128xf32> to vector<8x128xf32>
    %95 = arith.truncf %91 : vector<8x128xf32> to vector<8x128xbf16>
    %cst_37 = arith.constant dense<0.000000e+00> : vector<8x128xf32>
    %96 = tpu.matmul %95, %0, %cst_37 {dimension_numbers = #tpu.dot_dimension_numbers<[1], [0], [0], [1], [0, 0, 1, 1], [], []>} : vector<8x128xbf16>, vector<128x128xbf16>, vector<8x128xf32> -> vector<8x128xf32>
    %97 = arith.addf %94, %96 : vector<8x128xf32>
    %cst_38 = arith.constant 5.000000e-01 : f32
    %98 = vector.broadcast %cst_38 : f32 to vector<8x128xf32>
    %99 = arith.mulf %98, %97 : vector<8x128xf32>
    %100 = arith.select %6, %97, %99 : vector<8x128xi1>, vector<8x128xf32>
    %101 = math.tanh %100 : vector<8x128xf32>
    %cst_39 = arith.constant 5.000000e-01 : f32
    %102 = vector.broadcast %cst_39 : f32 to vector<8x128xf32>
    %103 = arith.mulf %102, %101 : vector<8x128xf32>
    %cst_40 = arith.constant 5.000000e-01 : f32
    %104 = vector.broadcast %cst_40 : f32 to vector<8x128xf32>
    %105 = arith.addf %103, %104 : vector<8x128xf32>
    %106 = arith.select %6, %101, %105 : vector<8x128xi1>, vector<8x128xf32>
    %c96_i32_41 = arith.constant 96 : i32
    %107 = tpu.dynamic_rotate %106 by %c96_i32_41 dim 1 : vector<8x128xf32>, i32 -> vector<8x128xf32>
    %c64_i32_42 = arith.constant 64 : i32
    %108 = tpu.dynamic_rotate %106 by %c64_i32_42 dim 1 : vector<8x128xf32>, i32 -> vector<8x128xf32>
    %c32_i32_43 = arith.constant 32 : i32
    %109 = tpu.dynamic_rotate %106 by %c32_i32_43 dim 1 : vector<8x128xf32>, i32 -> vector<8x128xf32>
    %110 = arith.mulf %107, %87 : vector<8x128xf32>
    %111 = arith.mulf %106, %108 : vector<8x128xf32>
    %112 = arith.addf %110, %111 : vector<8x128xf32>
    %cst_44 = arith.constant 0.000000e+00 : f32
    %113 = vector.broadcast %cst_44 : f32 to vector<8x128xf32>
    %114 = arith.select %8, %112, %113 : vector<8x128xi1>, vector<8x128xf32>
    %115 = math.tanh %114 : vector<8x128xf32>
    %116 = arith.mulf %109, %115 : vector<8x128xf32>
    %cst_45 = arith.constant 0.000000e+00 : f32
    %117 = vector.broadcast %cst_45 : f32 to vector<8x128xf32>
    %118 = arith.select %8, %116, %117 : vector<8x128xi1>, vector<8x128xf32>
    %c4_i32 = arith.constant 4 : i32
    %119 = arith.index_cast %c4_i32 : i32 to index
    %c0_46 = arith.constant 0 : index
    %c0_47 = arith.constant 0 : index
    %120 = vector.load %arg0[%119, %c0_46, %c0_47] : memref<8x8x128xf32, #tpu.memory_space<vmem>>, vector<1x8x128xf32>
    %121 = vector.shape_cast %120 : vector<1x8x128xf32> to vector<8x128xf32>
    %122 = arith.truncf %118 : vector<8x128xf32> to vector<8x128xbf16>
    %cst_48 = arith.constant dense<0.000000e+00> : vector<8x128xf32>
    %123 = tpu.matmul %122, %0, %cst_48 {dimension_numbers = #tpu.dot_dimension_numbers<[1], [0], [0], [1], [0, 0, 1, 1], [], []>} : vector<8x128xbf16>, vector<128x128xbf16>, vector<8x128xf32> -> vector<8x128xf32>
    %124 = arith.addf %121, %123 : vector<8x128xf32>
    %cst_49 = arith.constant 5.000000e-01 : f32
    %125 = vector.broadcast %cst_49 : f32 to vector<8x128xf32>
    %126 = arith.mulf %125, %124 : vector<8x128xf32>
    %127 = arith.select %6, %124, %126 : vector<8x128xi1>, vector<8x128xf32>
    %128 = math.tanh %127 : vector<8x128xf32>
    %cst_50 = arith.constant 5.000000e-01 : f32
    %129 = vector.broadcast %cst_50 : f32 to vector<8x128xf32>
    %130 = arith.mulf %129, %128 : vector<8x128xf32>
    %cst_51 = arith.constant 5.000000e-01 : f32
    %131 = vector.broadcast %cst_51 : f32 to vector<8x128xf32>
    %132 = arith.addf %130, %131 : vector<8x128xf32>
    %133 = arith.select %6, %128, %132 : vector<8x128xi1>, vector<8x128xf32>
    %c96_i32_52 = arith.constant 96 : i32
    %134 = tpu.dynamic_rotate %133 by %c96_i32_52 dim 1 : vector<8x128xf32>, i32 -> vector<8x128xf32>
    %c64_i32_53 = arith.constant 64 : i32
    %135 = tpu.dynamic_rotate %133 by %c64_i32_53 dim 1 : vector<8x128xf32>, i32 -> vector<8x128xf32>
    %c32_i32_54 = arith.constant 32 : i32
    %136 = tpu.dynamic_rotate %133 by %c32_i32_54 dim 1 : vector<8x128xf32>, i32 -> vector<8x128xf32>
    %137 = arith.mulf %134, %114 : vector<8x128xf32>
    %138 = arith.mulf %133, %135 : vector<8x128xf32>
    %139 = arith.addf %137, %138 : vector<8x128xf32>
    %cst_55 = arith.constant 0.000000e+00 : f32
    %140 = vector.broadcast %cst_55 : f32 to vector<8x128xf32>
    %141 = arith.select %8, %139, %140 : vector<8x128xi1>, vector<8x128xf32>
    %142 = math.tanh %141 : vector<8x128xf32>
    %143 = arith.mulf %136, %142 : vector<8x128xf32>
    %cst_56 = arith.constant 0.000000e+00 : f32
    %144 = vector.broadcast %cst_56 : f32 to vector<8x128xf32>
    %145 = arith.select %8, %143, %144 : vector<8x128xi1>, vector<8x128xf32>
    %c5_i32 = arith.constant 5 : i32
    %146 = arith.index_cast %c5_i32 : i32 to index
    %c0_57 = arith.constant 0 : index
    %c0_58 = arith.constant 0 : index
    %147 = vector.load %arg0[%146, %c0_57, %c0_58] : memref<8x8x128xf32, #tpu.memory_space<vmem>>, vector<1x8x128xf32>
    %148 = vector.shape_cast %147 : vector<1x8x128xf32> to vector<8x128xf32>
    %149 = arith.truncf %145 : vector<8x128xf32> to vector<8x128xbf16>
    %cst_59 = arith.constant dense<0.000000e+00> : vector<8x128xf32>
    %150 = tpu.matmul %149, %0, %cst_59 {dimension_numbers = #tpu.dot_dimension_numbers<[1], [0], [0], [1], [0, 0, 1, 1], [], []>} : vector<8x128xbf16>, vector<128x128xbf16>, vector<8x128xf32> -> vector<8x128xf32>
    %151 = arith.addf %148, %150 : vector<8x128xf32>
    %cst_60 = arith.constant 5.000000e-01 : f32
    %152 = vector.broadcast %cst_60 : f32 to vector<8x128xf32>
    %153 = arith.mulf %152, %151 : vector<8x128xf32>
    %154 = arith.select %6, %151, %153 : vector<8x128xi1>, vector<8x128xf32>
    %155 = math.tanh %154 : vector<8x128xf32>
    %cst_61 = arith.constant 5.000000e-01 : f32
    %156 = vector.broadcast %cst_61 : f32 to vector<8x128xf32>
    %157 = arith.mulf %156, %155 : vector<8x128xf32>
    %cst_62 = arith.constant 5.000000e-01 : f32
    %158 = vector.broadcast %cst_62 : f32 to vector<8x128xf32>
    %159 = arith.addf %157, %158 : vector<8x128xf32>
    %160 = arith.select %6, %155, %159 : vector<8x128xi1>, vector<8x128xf32>
    %c96_i32_63 = arith.constant 96 : i32
    %161 = tpu.dynamic_rotate %160 by %c96_i32_63 dim 1 : vector<8x128xf32>, i32 -> vector<8x128xf32>
    %c64_i32_64 = arith.constant 64 : i32
    %162 = tpu.dynamic_rotate %160 by %c64_i32_64 dim 1 : vector<8x128xf32>, i32 -> vector<8x128xf32>
    %c32_i32_65 = arith.constant 32 : i32
    %163 = tpu.dynamic_rotate %160 by %c32_i32_65 dim 1 : vector<8x128xf32>, i32 -> vector<8x128xf32>
    %164 = arith.mulf %161, %141 : vector<8x128xf32>
    %165 = arith.mulf %160, %162 : vector<8x128xf32>
    %166 = arith.addf %164, %165 : vector<8x128xf32>
    %cst_66 = arith.constant 0.000000e+00 : f32
    %167 = vector.broadcast %cst_66 : f32 to vector<8x128xf32>
    %168 = arith.select %8, %166, %167 : vector<8x128xi1>, vector<8x128xf32>
    %169 = math.tanh %168 : vector<8x128xf32>
    %170 = arith.mulf %163, %169 : vector<8x128xf32>
    %cst_67 = arith.constant 0.000000e+00 : f32
    %171 = vector.broadcast %cst_67 : f32 to vector<8x128xf32>
    %172 = arith.select %8, %170, %171 : vector<8x128xi1>, vector<8x128xf32>
    %c6_i32 = arith.constant 6 : i32
    %173 = arith.index_cast %c6_i32 : i32 to index
    %c0_68 = arith.constant 0 : index
    %c0_69 = arith.constant 0 : index
    %174 = vector.load %arg0[%173, %c0_68, %c0_69] : memref<8x8x128xf32, #tpu.memory_space<vmem>>, vector<1x8x128xf32>
    %175 = vector.shape_cast %174 : vector<1x8x128xf32> to vector<8x128xf32>
    %176 = arith.truncf %172 : vector<8x128xf32> to vector<8x128xbf16>
    %cst_70 = arith.constant dense<0.000000e+00> : vector<8x128xf32>
    %177 = tpu.matmul %176, %0, %cst_70 {dimension_numbers = #tpu.dot_dimension_numbers<[1], [0], [0], [1], [0, 0, 1, 1], [], []>} : vector<8x128xbf16>, vector<128x128xbf16>, vector<8x128xf32> -> vector<8x128xf32>
    %178 = arith.addf %175, %177 : vector<8x128xf32>
    %cst_71 = arith.constant 5.000000e-01 : f32
    %179 = vector.broadcast %cst_71 : f32 to vector<8x128xf32>
    %180 = arith.mulf %179, %178 : vector<8x128xf32>
    %181 = arith.select %6, %178, %180 : vector<8x128xi1>, vector<8x128xf32>
    %182 = math.tanh %181 : vector<8x128xf32>
    %cst_72 = arith.constant 5.000000e-01 : f32
    %183 = vector.broadcast %cst_72 : f32 to vector<8x128xf32>
    %184 = arith.mulf %183, %182 : vector<8x128xf32>
    %cst_73 = arith.constant 5.000000e-01 : f32
    %185 = vector.broadcast %cst_73 : f32 to vector<8x128xf32>
    %186 = arith.addf %184, %185 : vector<8x128xf32>
    %187 = arith.select %6, %182, %186 : vector<8x128xi1>, vector<8x128xf32>
    %c96_i32_74 = arith.constant 96 : i32
    %188 = tpu.dynamic_rotate %187 by %c96_i32_74 dim 1 : vector<8x128xf32>, i32 -> vector<8x128xf32>
    %c64_i32_75 = arith.constant 64 : i32
    %189 = tpu.dynamic_rotate %187 by %c64_i32_75 dim 1 : vector<8x128xf32>, i32 -> vector<8x128xf32>
    %c32_i32_76 = arith.constant 32 : i32
    %190 = tpu.dynamic_rotate %187 by %c32_i32_76 dim 1 : vector<8x128xf32>, i32 -> vector<8x128xf32>
    %191 = arith.mulf %188, %168 : vector<8x128xf32>
    %192 = arith.mulf %187, %189 : vector<8x128xf32>
    %193 = arith.addf %191, %192 : vector<8x128xf32>
    %cst_77 = arith.constant 0.000000e+00 : f32
    %194 = vector.broadcast %cst_77 : f32 to vector<8x128xf32>
    %195 = arith.select %8, %193, %194 : vector<8x128xi1>, vector<8x128xf32>
    %196 = math.tanh %195 : vector<8x128xf32>
    %197 = arith.mulf %190, %196 : vector<8x128xf32>
    %cst_78 = arith.constant 0.000000e+00 : f32
    %198 = vector.broadcast %cst_78 : f32 to vector<8x128xf32>
    %199 = arith.select %8, %197, %198 : vector<8x128xi1>, vector<8x128xf32>
    %c7_i32 = arith.constant 7 : i32
    %200 = arith.index_cast %c7_i32 : i32 to index
    %c0_79 = arith.constant 0 : index
    %c0_80 = arith.constant 0 : index
    %201 = vector.load %arg0[%200, %c0_79, %c0_80] : memref<8x8x128xf32, #tpu.memory_space<vmem>>, vector<1x8x128xf32>
    %202 = vector.shape_cast %201 : vector<1x8x128xf32> to vector<8x128xf32>
    %203 = arith.truncf %199 : vector<8x128xf32> to vector<8x128xbf16>
    %cst_81 = arith.constant dense<0.000000e+00> : vector<8x128xf32>
    %204 = tpu.matmul %203, %0, %cst_81 {dimension_numbers = #tpu.dot_dimension_numbers<[1], [0], [0], [1], [0, 0, 1, 1], [], []>} : vector<8x128xbf16>, vector<128x128xbf16>, vector<8x128xf32> -> vector<8x128xf32>
    %205 = arith.addf %202, %204 : vector<8x128xf32>
    %cst_82 = arith.constant 5.000000e-01 : f32
    %206 = vector.broadcast %cst_82 : f32 to vector<8x128xf32>
    %207 = arith.mulf %206, %205 : vector<8x128xf32>
    %208 = arith.select %6, %205, %207 : vector<8x128xi1>, vector<8x128xf32>
    %209 = math.tanh %208 : vector<8x128xf32>
    %cst_83 = arith.constant 5.000000e-01 : f32
    %210 = vector.broadcast %cst_83 : f32 to vector<8x128xf32>
    %211 = arith.mulf %210, %209 : vector<8x128xf32>
    %cst_84 = arith.constant 5.000000e-01 : f32
    %212 = vector.broadcast %cst_84 : f32 to vector<8x128xf32>
    %213 = arith.addf %211, %212 : vector<8x128xf32>
    %214 = arith.select %6, %209, %213 : vector<8x128xi1>, vector<8x128xf32>
    %c96_i32_85 = arith.constant 96 : i32
    %215 = tpu.dynamic_rotate %214 by %c96_i32_85 dim 1 : vector<8x128xf32>, i32 -> vector<8x128xf32>
    %c64_i32_86 = arith.constant 64 : i32
    %216 = tpu.dynamic_rotate %214 by %c64_i32_86 dim 1 : vector<8x128xf32>, i32 -> vector<8x128xf32>
    %c32_i32_87 = arith.constant 32 : i32
    %217 = tpu.dynamic_rotate %214 by %c32_i32_87 dim 1 : vector<8x128xf32>, i32 -> vector<8x128xf32>
    %218 = arith.mulf %215, %195 : vector<8x128xf32>
    %219 = arith.mulf %214, %216 : vector<8x128xf32>
    %220 = arith.addf %218, %219 : vector<8x128xf32>
    %cst_88 = arith.constant 0.000000e+00 : f32
    %221 = vector.broadcast %cst_88 : f32 to vector<8x128xf32>
    %222 = arith.select %8, %220, %221 : vector<8x128xi1>, vector<8x128xf32>
    %223 = math.tanh %222 : vector<8x128xf32>
    %224 = arith.mulf %217, %223 : vector<8x128xf32>
    %cst_89 = arith.constant 0.000000e+00 : f32
    %225 = vector.broadcast %cst_89 : f32 to vector<8x128xf32>
    %226 = arith.select %8, %224, %225 : vector<8x128xi1>, vector<8x128xf32>
    %c8_i32 = arith.constant 8 : i32
    %c0_90 = arith.constant 0 : index
    %c0_91 = arith.constant 0 : index
    %227 = vector.load %arg2[%c0_90, %c0_91] : memref<128x128xf32, #tpu.memory_space<vmem>>, vector<128x128xf32>
    %cst_92 = arith.constant dense<0.000000e+00> : vector<8x128xf32>
    %228 = tpu.matmul %226, %227, %cst_92 {dimension_numbers = #tpu.dot_dimension_numbers<[1], [0], [0], [1], [0, 0, 1, 1], [], []>} : vector<8x128xf32>, vector<128x128xf32>, vector<8x128xf32> -> vector<8x128xf32>
    %c0_93 = arith.constant 0 : index
    %c0_94 = arith.constant 0 : index
    %229 = vector.load %arg3[%c0_93, %c0_94] : memref<1x128xf32, #tpu.memory_space<vmem>>, vector<1x128xf32>
    %230 = vector.broadcast %229 : vector<1x128xf32> to vector<8x128xf32>
    %231 = arith.addf %228, %230 : vector<8x128xf32>
    %c0_95 = arith.constant 0 : index
    %c0_96 = arith.constant 0 : index
    %232 = vector.load %arg4[%c0_95, %c0_96] : memref<8x128xf32, #tpu.memory_space<vmem>>, vector<8x128xf32>
    tpu.vector_store %arg4[%c0_95, %c0_96], %231 {strides = array<i32>} : memref<8x128xf32, #tpu.memory_space<vmem>>, vector<8x128xf32>,
    return
  }
}

</mosaic_0001>

<bundles_post_ra>
// kernel: tpu_custom_call.1
= control target key start
LH: loop header
LB: loop body
LE: loop exit
PB: predicated region body
PF: predicated region fallthrough
CT: control target
= control target key end

     0   :  { %9 = vsyncpa [#allocation3], 0  ;;  %s1537_s0 = inlined_call_operand.hbm [shape: f32[8,8,128], index: 0, kind: input, shape index: {}]   ;;  %s1538_s1 = inlined_call_operand.hbm [shape: bf16[128,128], index: 1, kind: input, shape index: {}]   ;;  %s1539_s2 = inlined_call_operand.hbm [shape: f32[128,128], index: 2, kind: input, shape index: {}]   ;;  %s1540_s3 = inlined_call_operand.vmem [shape: f32[1,128], index: 3, kind: input, shape index: {}]   ;;  %s1541_s4 = inlined_call_operand.hbm [shape: f32[8,128], index: 4, kind: output, shape index: {}]  }
   0x1   :  { %10 = vsyncpa [#allocation6], 0 }
   0x2   :  { %11 = vsyncpa [#allocation4], 0  ;;  %s1196_s15 = smov [#allocation5]  }
   0x3   :  { %s29_s16 = sshll.u32 %s1196_s15, 4  ;;  %s30_s16 = int_to_ptr.vmem [resolvable:$true] %s29_s16 }
   0x4   :  { %s1118_s17 = scalar_lea.vmem %s30_s16, 1024  ;;  %p1123_p1 = scmp.lt.s32.totalorder %s30_s16, %s30_s16 }
   0x5   :  { %p1119_p0 = scmp.ne.s32.totalorder %s30_s16, %s1118_s17  ;;  %p1124_p2 = scmp.lt.s32.totalorder %s1118_s17, %s1118_s17 }
   0x7   :  { %p1125_p3 = por %p1124_p2, %p1123_p1 }
   0x9   :  { %p1126_p4 = pnand %p1125_p3, %p1119_p0 }
   0xb   :  { %1129 = shalt.err (!%p1126_p4)
}
   0xc   :  { %s1197_s18 = smov 64   ;;  %s1198_s19 = smov 4  }
   0xd   :  { %35 = dma.hbm_to_vmem [thread:$0]  %s1538_s1, 1024, %s30_s16, [#allocation6], %s1197_s18, %s1197_s18, %s1198_s19  }
   0xe   :  { %s1199_s22 = smov [#allocation2]  }
   0xf   :  { %s17_s23 = sshll.u32 %s1199_s22, 4  ;;  %s18_s23 = int_to_ptr.vmem [resolvable:$true] %s17_s23 }
  0x10   :  { %s1138_s24 = scalar_lea.vmem %s18_s23, 1024  ;;  %p1143_p6 = scmp.lt.s32.totalorder %s18_s23, %s18_s23 }
  0x11   :  { %p1139_p5 = scmp.ne.s32.totalorder %s18_s23, %s1138_s24  ;;  %p1144_p7 = scmp.lt.s32.totalorder %s1138_s24, %s1138_s24 }
  0x13   :  { %p1145_p8 = por %p1144_p7, %p1143_p6 }
  0x15   :  { %p1146_p9 = pnand %p1145_p8, %p1139_p5 }
  0x17   :  { %1149 = shalt.err (!%p1146_p9)
}
  0x18   :  { %s1200_s25 = smov 128   ;;  %s1201_s26 = smov 8  }
  0x19   :  { %23 = dma.hbm_to_vmem [thread:$0]  %s1537_s0, 1024, %s18_s23, [#allocation3], %s1200_s25, %s1200_s25, %s1201_s26  }
  0x1a   :  { %s1202_s29 = smov [#allocation7]  }
  0x1b   :  { %s41_s30 = sshll.u32 %s1202_s29, 4  ;;  %s42_s30 = int_to_ptr.vmem [resolvable:$true] %s41_s30 }
  0x1c   :  { %s1158_s1 = scalar_lea.vmem %s42_s30, 2048  ;;  %p1163_p11 = scmp.lt.s32.totalorder %s42_s30, %s42_s30 }
  0x1d   :  { %p1159_p10 = scmp.ne.s32.totalorder %s42_s30, %s1158_s1  ;;  %p1164_p12 = scmp.lt.s32.totalorder %s1158_s1, %s1158_s1 }
  0x1f   :  { %p1165_p13 = por %p1164_p12, %p1163_p11 }
  0x21   :  { %p1166_p0 = pnand %p1165_p13, %p1159_p10 }
  0x23   :  { %1169 = shalt.err (!%p1166_p0)
}
  0x24   :  { %47 = dma.hbm_to_vmem [thread:$0]  %s1539_s2, 2048, %s42_s30, [#allocation6], %s1200_s25, %s1200_s25, %s1201_s26  }
  0x25   :  { %1190 = dma.done.wait [#allocation3], 1024  }
  0x26   :  { %1191 = vsyncadd [#allocation3], 4294966272 }
  0x27   :  { %1192 = dma.done.wait [#allocation6], 3072  }
  0x28   :  { %1193 = vsyncadd [#allocation6], 4294964224  ;;  %v1203_v0 = vmov 0.0   ;;  %vm1204_vm0 = vmmov 0   ;;  %v1251_v1 = vld [vmem:[#allocation5 + $0x38] sm:$0xff]   ;;  %v1254_v2 = vld [vmem:[#allocation5 + $0x30] sm:$0xff]   ;;  %v76_v10 = vlaneseq }
  0x29   :  { %862 = vmatprep.subr.bf16.mxu0 %v1203_v0  ;;  %878 = vmatprep.mubr.msk.bf16.mxu0 %vm1204_vm0, %v1203_v0  ;;  %v1260_v3 = vld [vmem:[#allocation5 + $0x28] sm:$0xff]   ;;  %v1266_v4 = vld [vmem:[#allocation5 + $0x20] sm:$0xff]   ;;  %v1272_v5 = vld [vmem:[#allocation5 + $0x18] sm:$0xff]   ;;  %v1205_v9 = vmov 0   ;;  %s1206_s0 = smov 32   ;;  %s1207_s2 = smov 96  }
  0x2a   :  { %882 = vmatprep.subr.bf16.mxu1 %v1203_v0  ;;  %898 = vmatprep.mubr.msk.bf16.mxu1 %vm1204_vm0, %v1203_v0  ;;  %v1278_v6 = vld [vmem:[#allocation5 + $0x10] sm:$0xff]   ;;  %v1284_v7 = vld [vmem:[#allocation5 + $0x8] sm:$0xff]   ;;  %v1290_v8 = vld [vmem:[#allocation5] sm:$0xff]   ;;  %v1317_v11 = vand.u32 127, %v76_v10  ;;  %s1208_s9 = smov [#allocation8]  }
  0x2b   :  { %863 = vmatpush3.bf16.msra.mxu0 %v1251_v1  ;;  %883 = vmatpush3.bf16.msra.mxu1 %v1251_v1  ;;  %v82_v12 = vld [vmem:[#allocation2] sm:$0xff]  ;;  %v192_v36 = vld [vmem:[#allocation2 + $0x8] sm:$0xff]  ;;  %v255_v58 = vld [vmem:[#allocation2 + $0x10] sm:$0xff]  ;;  %s732_s10 = sshll.u32 %s1208_s9, 4  ;;  %s733_s10 = int_to_ptr.vmem [resolvable:$true] %s732_s10 }
  0x2c   :  { %864 = vmatprep.subr.bf16.mxu0 %v1203_v0  ;;  %884 = vmatprep.subr.bf16.mxu1 %v1203_v0  ;;  %vm78_vm1 = vcmp.ge.s32.totalorder %v1317_v11, 64  ;;  %vm79_vm2 = vcmp.lt.s32.totalorder %v1317_v11, 96  ;;  %vm81_vm4 = vcmp.lt.s32.totalorder %v1317_v11, 32  ;;  %v570_v34 = vld [vmem:[#allocation2 + $0x38] sm:$0xff]  ;;  %v632_v15 = vld [vmem:[#allocation7] sm:$0xff]  ;;  %s1170_s11 = scalar_lea.vmem %s733_s10, 128  ;;  %p1175_p2 = scmp.lt.s32.totalorder %s733_s10, %s733_s10 }
  0x2d   :  { %vm1321_vm3 = vmand %vm78_vm1, %vm79_vm2  ;;  %p1171_p1 = scmp.ne.s32.totalorder %s733_s10, %s1170_s11  ;;  %p1176_p3 = scmp.lt.s32.totalorder %s1170_s11, %s1170_s11 }
  0x2e   :  { %vm1338_vm5 = vmpackc.low %vm81_vm4, %vm81_vm4 }
  0x2f   :  { %865 = vmatpush3.bf16.msra.mxu0 %v1254_v2  ;;  %885 = vmatpush3.bf16.msra.mxu1 %v1254_v2  ;;  %p1177_p4 = por %p1176_p3, %p1175_p2 }
  0x30   :  { %866 = vmatprep.subr.bf16.mxu0 %v1203_v0  ;;  %886 = vmatprep.subr.bf16.mxu1 %v1203_v0 }
  0x31   :  { %p1178_p5 = pnand %p1177_p4, %p1171_p1 }
  0x33   :  { %867 = vmatpush3.bf16.msra.mxu0 %v1260_v3  ;;  %887 = vmatpush3.bf16.msra.mxu1 %v1260_v3 }
  0x34   :  { %868 = vmatprep.subr.bf16.mxu0 %v1203_v0  ;;  %888 = vmatprep.subr.bf16.mxu1 %v1203_v0 }
  0x37   :  { %869 = vmatpush3.bf16.msra.mxu0 %v1266_v4  ;;  %889 = vmatpush3.bf16.msra.mxu1 %v1266_v4 }
  0x38   :  { %870 = vmatprep.subr.bf16.mxu0 %v1203_v0  ;;  %890 = vmatprep.subr.bf16.mxu1 %v1203_v0 }
  0x3b   :  { %871 = vmatpush3.bf16.msra.mxu0 %v1272_v5  ;;  %891 = vmatpush3.bf16.msra.mxu1 %v1272_v5 }
  0x3c   :  { %872 = vmatprep.subr.bf16.mxu0 %v1203_v0  ;;  %892 = vmatprep.subr.bf16.mxu1 %v1203_v0 }
  0x3f   :  { %873 = vmatpush3.bf16.msra.mxu0 %v1278_v6  ;;  %893 = vmatpush3.bf16.msra.mxu1 %v1278_v6 }
  0x40   :  { %874 = vmatprep.subr.bf16.mxu0 %v1203_v0  ;;  %894 = vmatprep.subr.bf16.mxu1 %v1203_v0 }
  0x43   :  { %875 = vmatpush3.bf16.msra.mxu0 %v1284_v7  ;;  %895 = vmatpush3.bf16.msra.mxu1 %v1284_v7 }
  0x44   :  { %876 = vmatprep.subr.bf16.mxu0 %v1203_v0  ;;  %896 = vmatprep.subr.bf16.mxu1 %v1203_v0 }
  0x47   :  { %877 = vmatpush3.bf16.msra.mxu0 %v1290_v8  ;;  %897 = vmatpush3.bf16.msra.mxu1 %v1290_v8 }
  0x48   :  { %902 = vmatprep.subr.bf16.mxu0 %v1203_v0  ;;  %922 = vmatprep.subr.bf16.mxu1 %v1203_v0 }
  0x4a   :  { %879 = vmatmul.mubr.bf16.vlgmr.msra.gmra.mxu0 %v1205_v9 }
  0x4b   :  { %903 = vmatpush3.bf16.msra.mxu0 %v1251_v1  ;;  %918 = vmatprep.mubr.msk.bf16.mxu0 %vm1204_vm0, %v1203_v0 }
  0x4c   :  { %904 = vmatprep.subr.bf16.mxu0 %v1203_v0 }
  0x4f   :  { %905 = vmatpush3.bf16.msra.mxu0 %v1254_v2 }
  0x50   :  { %906 = vmatprep.subr.bf16.mxu0 %v1203_v0 }
  0x53   :  { %907 = vmatpush3.bf16.msra.mxu0 %v1260_v3 }
  0x54   :  { %908 = vmatprep.subr.bf16.mxu0 %v1203_v0 }
  0x57   :  { %909 = vmatpush3.bf16.msra.mxu0 %v1266_v4 }
  0x58   :  { %910 = vmatprep.subr.bf16.mxu0 %v1203_v0 }
  0x5b   :  { %911 = vmatpush3.bf16.msra.mxu0 %v1272_v5 }
  0x5c   :  { %912 = vmatprep.subr.bf16.mxu0 %v1203_v0 }
  0x5f   :  { %913 = vmatpush3.bf16.msra.mxu0 %v1278_v6 }
  0x60   :  { %914 = vmatprep.subr.bf16.mxu0 %v1203_v0 }
  0x63   :  { %915 = vmatpush3.bf16.msra.mxu0 %v1284_v7 }
  0x64   :  { %916 = vmatprep.subr.bf16.mxu0 %v1203_v0 }
  0x67   :  { %917 = vmatpush3.bf16.msra.mxu0 %v1290_v8 }
  0x68   :  { %942 = vmatprep.subr.bf16.mxu0 %v1203_v0 }
 0x10a   :  { %v165_v13 = vpop.f32.mrf.mxu0 }
 0x10b   :  { %v171_v14 = vadd.f32 %v165_v13, %v82_v12 }
 0x10c   :  { %v880_v16 = vpop.f32.mrf.mxu0 }
 0x10d   :  { %v172_v17 = vmul.f32 0.5, %v171_v14 }
 0x10e   :  { %v168_v18 = vpop.f32.mrf.mxu0 }
 0x10f   :  { %v173_v19 = vsel %vm1321_vm3, %v171_v14, %v172_v17 }
 0x110   :  { %1078 = vtanh.f32 %v173_v19  ;;  %v881_v20 = vpop.f32.mrf.mxu0 }
 0x11d   :  { %v1079_v21 = vpop.eup %1078 }
 0x11e   :  { %v175_v22 = vmul.f32 0.5, %v1079_v21 }
 0x120   :  { %v176_v23 = vadd.f32 0.5, %v175_v22 }
 0x122   :  { %v177_v24 = vsel %vm1321_vm3, %v1079_v21, %v176_v23 }
 0x123   :  { %182 = vrot.lane.b32.xlu1 %v177_v24, %s1206_s0  ;;  %178 = vrot.lane.b32.xlu0 %v177_v24, %s1207_s2 }
 0x127   :  { %180 = vrot.lane.b32.xlu0 %v177_v24, %s1197_s18 }
 0x195   :  { %v179_v25 = vpop.permute.xlu0 %178  ;;  %v183_v32 = vpop.permute.xlu1 %182 }
 0x196   :  { %v184_v27 = vmul.f32 0.0, %v179_v25 }
 0x199   :  { %v181_v26 = vpop.permute.xlu0 %180 }
 0x19a   :  { %v185_v28 = vmul.f32 %v181_v26, %v177_v24 }
 0x19c   :  { %v186_v29 = vadd.f32 %v185_v28, %v184_v27  ;;  %v318_v27 = vld [vmem:[#allocation2 + $0x18] sm:$0xff] }
 0x19e   :  { %v187_v30 = vsel %vm81_vm4, %v186_v29, 0.0 }
 0x19f   :  { %1080 = vtanh.f32 %v187_v30 }
 0x1ac   :  { %v1081_v31 = vpop.eup %1080 }
 0x1ad   :  { %v189_v33 = vmul.f32 %v1081_v31, %v183_v32 }
 0x1af   :  { %v751_v35 = vpack.c.bf16 %v189_v33, %v189_v33 }
 0x1b1   :  { %899 = vmatmul.mubr.msk.bf16.vlgmr.msra.gmra.mxu1 %vm1338_vm5, %v751_v35 }
 0x1b2   :  { %923 = vmatpush3.bf16.msra.mxu1 %v1251_v1  ;;  %938 = vmatprep.mubr.msk.bf16.mxu1 %vm1204_vm0, %v1203_v0 }
 0x1b3   :  { %924 = vmatprep.subr.bf16.mxu1 %v1203_v0 }
 0x1b6   :  { %925 = vmatpush3.bf16.msra.mxu1 %v1254_v2 }
 0x1b7   :  { %926 = vmatprep.subr.bf16.mxu1 %v1203_v0 }
 0x1ba   :  { %927 = vmatpush3.bf16.msra.mxu1 %v1260_v3 }
 0x1bb   :  { %928 = vmatprep.subr.bf16.mxu1 %v1203_v0 }
 0x1be   :  { %929 = vmatpush3.bf16.msra.mxu1 %v1266_v4 }
 0x1bf   :  { %930 = vmatprep.subr.bf16.mxu1 %v1203_v0 }
 0x1c2   :  { %931 = vmatpush3.bf16.msra.mxu1 %v1272_v5 }
 0x1c3   :  { %932 = vmatprep.subr.bf16.mxu1 %v1203_v0 }
 0x1c6   :  { %933 = vmatpush3.bf16.msra.mxu1 %v1278_v6 }
 0x1c7   :  { %934 = vmatprep.subr.bf16.mxu1 %v1203_v0 }
 0x1ca   :  { %935 = vmatpush3.bf16.msra.mxu1 %v1284_v7 }
 0x1cb   :  { %936 = vmatprep.subr.bf16.mxu1 %v1203_v0 }
 0x1ce   :  { %937 = vmatpush3.bf16.msra.mxu1 %v1290_v8 }
 0x1cf   :  { %962 = vmatprep.subr.bf16.mxu1 %v1203_v0 }
 0x271   :  { %v228_v37 = vpop.f32.mrf.mxu1 }
 0x272   :  { %v234_v38 = vadd.f32 %v228_v37, %v192_v36 }
 0x273   :  { %v900_v39 = vpop.f32.mrf.mxu1 }
 0x274   :  { %v235_v40 = vmul.f32 0.5, %v234_v38 }
 0x275   :  { %v231_v41 = vpop.f32.mrf.mxu1 }
 0x276   :  { %v236_v42 = vsel %vm1321_vm3, %v234_v38, %v235_v40 }
 0x277   :  { %1082 = vtanh.f32 %v236_v42  ;;  %v901_v43 = vpop.f32.mrf.mxu1 }
 0x284   :  { %v1083_v44 = vpop.eup %1082 }
 0x285   :  { %v238_v45 = vmul.f32 0.5, %v1083_v44 }
 0x287   :  { %v239_v46 = vadd.f32 0.5, %v238_v45 }
 0x289   :  { %v240_v47 = vsel %vm1321_vm3, %v1083_v44, %v239_v46 }
 0x28a   :  { %243 = vrot.lane.b32.xlu0 %v240_v47, %s1197_s18  ;;  %241 = vrot.lane.b32.xlu1 %v240_v47, %s1207_s2 }
 0x28e   :  { %245 = vrot.lane.b32.xlu1 %v240_v47, %s1206_s0 }
 0x2fc   :  { %v244_v48 = vpop.permute.xlu0 %243  ;;  %v242_v49 = vpop.permute.xlu1 %241 }
 0x2fd   :  { %v248_v50 = vmul.f32 %v244_v48, %v240_v47  ;;  %v247_v51 = vmul.f32 %v242_v49, %v187_v30 }
 0x2ff   :  { %v249_v52 = vadd.f32 %v248_v50, %v247_v51  ;;  %v381_v50 = vld [vmem:[#allocation2 + $0x20] sm:$0xff] }
 0x300   :  { %v246_v55 = vpop.permute.xlu1 %245 }
 0x301   :  { %v250_v53 = vsel %vm81_vm4, %v249_v52, 0.0 }
 0x302   :  { %1084 = vtanh.f32 %v250_v53 }
 0x30f   :  { %v1085_v54 = vpop.eup %1084 }
 0x310   :  { %v252_v56 = vmul.f32 %v1085_v54, %v246_v55 }
 0x312   :  { %v754_v57 = vpack.c.bf16 %v252_v56, %v252_v56 }
 0x314   :  { %919 = vmatmul.mubr.msk.bf16.vlgmr.msra.gmra.mxu0 %vm1338_vm5, %v754_v57 }
 0x315   :  { %943 = vmatpush3.bf16.msra.mxu0 %v1251_v1  ;;  %958 = vmatprep.mubr.msk.bf16.mxu0 %vm1204_vm0, %v1203_v0 }
 0x316   :  { %944 = vmatprep.subr.bf16.mxu0 %v1203_v0 }
 0x319   :  { %945 = vmatpush3.bf16.msra.mxu0 %v1254_v2 }
 0x31a   :  { %946 = vmatprep.subr.bf16.mxu0 %v1203_v0 }
 0x31d   :  { %947 = vmatpush3.bf16.msra.mxu0 %v1260_v3 }
 0x31e   :  { %948 = vmatprep.subr.bf16.mxu0 %v1203_v0 }
 0x321   :  { %949 = vmatpush3.bf16.msra.mxu0 %v1266_v4 }
 0x322   :  { %950 = vmatprep.subr.bf16.mxu0 %v1203_v0 }
 0x325   :  { %951 = vmatpush3.bf16.msra.mxu0 %v1272_v5 }
 0x326   :  { %952 = vmatprep.subr.bf16.mxu0 %v1203_v0 }
 0x329   :  { %953 = vmatpush3.bf16.msra.mxu0 %v1278_v6 }
 0x32a   :  { %954 = vmatprep.subr.bf16.mxu0 %v1203_v0 }
 0x32d   :  { %955 = vmatpush3.bf16.msra.mxu0 %v1284_v7 }
 0x32e   :  { %956 = vmatprep.subr.bf16.mxu0 %v1203_v0 }
 0x331   :  { %957 = vmatpush3.bf16.msra.mxu0 %v1290_v8 }
 0x332   :  { %982 = vmatprep.subr.bf16.mxu0 %v1203_v0 }
 0x3d4   :  { %v291_v59 = vpop.f32.mrf.mxu0 }
 0x3d5   :  { %v297_v60 = vadd.f32 %v291_v59, %v255_v58 }
 0x3d6   :  { %v920_v61 = vpop.f32.mrf.mxu0 }
 0x3d7   :  { %v298_v62 = vmul.f32 0.5, %v297_v60 }
 0x3d8   :  { %v294_v63 = vpop.f32.mrf.mxu0 }
 0x3d9   :  { %v299_v9 = vsel %vm1321_vm3, %v297_v60, %v298_v62 }
 0x3da   :  { %1086 = vtanh.f32 %v299_v9  ;;  %v921_v10 = vpop.f32.mrf.mxu0 }
 0x3e7   :  { %v1087_v12 = vpop.eup %1086 }
 0x3e8   :  { %v301_v13 = vmul.f32 0.5, %v1087_v12 }
 0x3ea   :  { %v302_v14 = vadd.f32 0.5, %v301_v13 }
 0x3ec   :  { %v303_v16 = vsel %vm1321_vm3, %v1087_v12, %v302_v14 }
 0x3ed   :  { %306 = vrot.lane.b32.xlu1 %v303_v16, %s1197_s18  ;;  %304 = vrot.lane.b32.xlu0 %v303_v16, %s1207_s2 }
 0x3f1   :  { %308 = vrot.lane.b32.xlu0 %v303_v16, %s1206_s0 }
 0x45f   :  { %v307_v17 = vpop.permute.xlu1 %306  ;;  %v305_v18 = vpop.permute.xlu0 %304 }
 0x460   :  { %v311_v19 = vmul.f32 %v307_v17, %v303_v16  ;;  %v310_v20 = vmul.f32 %v305_v18, %v250_v53 }
 0x462   :  { %v312_v21 = vadd.f32 %v311_v19, %v310_v20 }
 0x463   :  { %v309_v24 = vpop.permute.xlu0 %308 }
 0x464   :  { %v313_v22 = vsel %vm81_vm4, %v312_v21, 0.0 }
 0x465   :  { %1088 = vtanh.f32 %v313_v22 }
 0x472   :  { %v1089_v23 = vpop.eup %1088 }
 0x473   :  { %v315_v25 = vmul.f32 %v1089_v23, %v309_v24 }
 0x475   :  { %v757_v26 = vpack.c.bf16 %v315_v25, %v315_v25 }
 0x477   :  { %939 = vmatmul.mubr.msk.bf16.vlgmr.msra.gmra.mxu1 %vm1338_vm5, %v757_v26 }
 0x478   :  { %963 = vmatpush3.bf16.msra.mxu1 %v1251_v1  ;;  %978 = vmatprep.mubr.msk.bf16.mxu1 %vm1204_vm0, %v1203_v0 }
 0x479   :  { %964 = vmatprep.subr.bf16.mxu1 %v1203_v0 }
 0x47c   :  { %965 = vmatpush3.bf16.msra.mxu1 %v1254_v2 }
 0x47d   :  { %966 = vmatprep.subr.bf16.mxu1 %v1203_v0 }
 0x480   :  { %967 = vmatpush3.bf16.msra.mxu1 %v1260_v3 }
 0x481   :  { %968 = vmatprep.subr.bf16.mxu1 %v1203_v0 }
 0x484   :  { %969 = vmatpush3.bf16.msra.mxu1 %v1266_v4 }
 0x485   :  { %970 = vmatprep.subr.bf16.mxu1 %v1203_v0 }
 0x488   :  { %971 = vmatpush3.bf16.msra.mxu1 %v1272_v5 }
 0x489   :  { %972 = vmatprep.subr.bf16.mxu1 %v1203_v0 }
 0x48c   :  { %973 = vmatpush3.bf16.msra.mxu1 %v1278_v6 }
 0x48d   :  { %974 = vmatprep.subr.bf16.mxu1 %v1203_v0 }
 0x490   :  { %975 = vmatpush3.bf16.msra.mxu1 %v1284_v7 }
 0x491   :  { %976 = vmatprep.subr.bf16.mxu1 %v1203_v0 }
 0x494   :  { %977 = vmatpush3.bf16.msra.mxu1 %v1290_v8 }
 0x495   :  { %1002 = vmatprep.subr.bf16.mxu1 %v1203_v0 }
 0x537   :  { %v354_v28 = vpop.f32.mrf.mxu1 }
 0x538   :  { %v360_v29 = vadd.f32 %v354_v28, %v318_v27 }
 0x539   :  { %v940_v30 = vpop.f32.mrf.mxu1 }
 0x53a   :  { %v361_v31 = vmul.f32 0.5, %v360_v29 }
 0x53b   :  { %v357_v32 = vpop.f32.mrf.mxu1 }
 0x53c   :  { %v362_v33 = vsel %vm1321_vm3, %v360_v29, %v361_v31 }
 0x53d   :  { %1090 = vtanh.f32 %v362_v33  ;;  %v941_v35 = vpop.f32.mrf.mxu1  ;;  %v507_v33 = vld [vmem:[#allocation2 + $0x30] sm:$0xff] }
 0x54a   :  { %v1091_v36 = vpop.eup %1090 }
 0x54b   :  { %v364_v37 = vmul.f32 0.5, %v1091_v36 }
 0x54d   :  { %v365_v38 = vadd.f32 0.5, %v364_v37 }
 0x54f   :  { %v366_v39 = vsel %vm1321_vm3, %v1091_v36, %v365_v38 }
 0x550   :  { %369 = vrot.lane.b32.xlu0 %v366_v39, %s1197_s18  ;;  %367 = vrot.lane.b32.xlu1 %v366_v39, %s1207_s2 }
 0x554   :  { %371 = vrot.lane.b32.xlu1 %v366_v39, %s1206_s0 }
 0x5c2   :  { %v370_v40 = vpop.permute.xlu0 %369  ;;  %v368_v41 = vpop.permute.xlu1 %367 }
 0x5c3   :  { %v374_v42 = vmul.f32 %v370_v40, %v366_v39  ;;  %v373_v43 = vmul.f32 %v368_v41, %v313_v22 }
 0x5c5   :  { %v375_v44 = vadd.f32 %v374_v42, %v373_v43 }
 0x5c6   :  { %v372_v47 = vpop.permute.xlu1 %371 }
 0x5c7   :  { %v376_v45 = vsel %vm81_vm4, %v375_v44, 0.0 }
 0x5c8   :  { %1092 = vtanh.f32 %v376_v45 }
 0x5d5   :  { %v1093_v46 = vpop.eup %1092 }
 0x5d6   :  { %v378_v48 = vmul.f32 %v1093_v46, %v372_v47 }
 0x5d8   :  { %v760_v49 = vpack.c.bf16 %v378_v48, %v378_v48 }
 0x5da   :  { %959 = vmatmul.mubr.msk.bf16.vlgmr.msra.gmra.mxu0 %vm1338_vm5, %v760_v49 }
 0x5db   :  { %983 = vmatpush3.bf16.msra.mxu0 %v1251_v1  ;;  %998 = vmatprep.mubr.msk.bf16.mxu0 %vm1204_vm0, %v1203_v0 }
 0x5dc   :  { %984 = vmatprep.subr.bf16.mxu0 %v1203_v0 }
 0x5df   :  { %985 = vmatpush3.bf16.msra.mxu0 %v1254_v2 }
 0x5e0   :  { %986 = vmatprep.subr.bf16.mxu0 %v1203_v0 }
 0x5e3   :  { %987 = vmatpush3.bf16.msra.mxu0 %v1260_v3 }
 0x5e4   :  { %988 = vmatprep.subr.bf16.mxu0 %v1203_v0 }
 0x5e7   :  { %989 = vmatpush3.bf16.msra.mxu0 %v1266_v4 }
 0x5e8   :  { %990 = vmatprep.subr.bf16.mxu0 %v1203_v0 }
 0x5eb   :  { %991 = vmatpush3.bf16.msra.mxu0 %v1272_v5 }
 0x5ec   :  { %992 = vmatprep.subr.bf16.mxu0 %v1203_v0 }
 0x5ef   :  { %993 = vmatpush3.bf16.msra.mxu0 %v1278_v6 }
 0x5f0   :  { %994 = vmatprep.subr.bf16.mxu0 %v1203_v0 }
 0x5f3   :  { %995 = vmatpush3.bf16.msra.mxu0 %v1284_v7 }
 0x5f4   :  { %996 = vmatprep.subr.bf16.mxu0 %v1203_v0 }
 0x5f7   :  { %997 = vmatpush3.bf16.msra.mxu0 %v1290_v8 }
 0x5f8   :  { %1022 = vmatprep.subr.mxu0 %v1203_v0 }
 0x69a   :  { %v417_v51 = vpop.f32.mrf.mxu0 }
 0x69b   :  { %v423_v52 = vadd.f32 %v417_v51, %v381_v50 }
 0x69c   :  { %v960_v53 = vpop.f32.mrf.mxu0 }
 0x69d   :  { %v424_v54 = vmul.f32 0.5, %v423_v52 }
 0x69e   :  { %v420_v55 = vpop.f32.mrf.mxu0 }
 0x69f   :  { %v425_v56 = vsel %vm1321_vm3, %v423_v52, %v424_v54 }
 0x6a0   :  { %1094 = vtanh.f32 %v425_v56  ;;  %v961_v57 = vpop.f32.mrf.mxu0  ;;  %v647_v56 = vld [vmem:[#allocation7 + $0x78] sm:$0xff] }
 0x6a1   :  { %v646_v57 = vld [vmem:[#allocation7 + $0x70] sm:$0xff] }
 0x6ad   :  { %v1095_v58 = vpop.eup %1094 }
 0x6ae   :  { %v427_v59 = vmul.f32 0.5, %v1095_v58 }
 0x6b0   :  { %v428_v60 = vadd.f32 0.5, %v427_v59  ;;  %v644_v59 = vld [vmem:[#allocation7 + $0x60] sm:$0xff] }
 0x6b2   :  { %v429_v61 = vsel %vm1321_vm3, %v1095_v58, %v428_v60  ;;  %v645_v58 = vld [vmem:[#allocation7 + $0x68] sm:$0xff]  ;;  %v643_v60 = vld [vmem:[#allocation7 + $0x58] sm:$0xff] }
 0x6b3   :  { %432 = vrot.lane.b32.xlu1 %v429_v61, %s1197_s18  ;;  %430 = vrot.lane.b32.xlu0 %v429_v61, %s1207_s2 }
 0x6b7   :  { %434 = vrot.lane.b32.xlu0 %v429_v61, %s1206_s0 }
 0x725   :  { %v433_v62 = vpop.permute.xlu1 %432  ;;  %v431_v63 = vpop.permute.xlu0 %430 }
 0x726   :  { %v437_v9 = vmul.f32 %v433_v62, %v429_v61  ;;  %v436_v10 = vmul.f32 %v431_v63, %v376_v45 }
 0x728   :  { %v438_v12 = vadd.f32 %v437_v9, %v436_v10 }
 0x729   :  { %v435_v16 = vpop.permute.xlu0 %434 }
 0x72a   :  { %v439_v13 = vsel %vm81_vm4, %v438_v12, 0.0 }
 0x72b   :  { %1096 = vtanh.f32 %v439_v13 }
 0x738   :  { %v1097_v14 = vpop.eup %1096 }
 0x739   :  { %v441_v17 = vmul.f32 %v1097_v14, %v435_v16  ;;  %v642_v14 = vld [vmem:[#allocation7 + $0x50] sm:$0xff]  ;;  %v641_v16 = vld [vmem:[#allocation7 + $0x48] sm:$0xff] }
 0x73b   :  { %v763_v18 = vpack.c.bf16 %v441_v17, %v441_v17  ;;  %v640_v17 = vld [vmem:[#allocation7 + $0x40] sm:$0xff] }
 0x73d   :  { %979 = vmatmul.mubr.msk.bf16.vlgmr.msra.gmra.mxu1 %vm1338_vm5, %v763_v18  ;;  %v639_v18 = vld [vmem:[#allocation7 + $0x38] sm:$0xff] }
 0x73e   :  { %1003 = vmatpush3.bf16.msra.mxu1 %v1251_v1  ;;  %1018 = vmatprep.mubr.msk.bf16.mxu1 %vm1204_vm0, %v1203_v0  ;;  %v444_v1 = vld [vmem:[#allocation2 + $0x28] sm:$0xff] }
 0x73f   :  { %1004 = vmatprep.subr.bf16.mxu1 %v1203_v0 }
 0x742   :  { %1005 = vmatpush3.bf16.msra.mxu1 %v1254_v2 }
 0x743   :  { %1006 = vmatprep.subr.bf16.mxu1 %v1203_v0 }
 0x746   :  { %1007 = vmatpush3.bf16.msra.mxu1 %v1260_v3 }
 0x747   :  { %1008 = vmatprep.subr.bf16.mxu1 %v1203_v0 }
 0x74a   :  { %1009 = vmatpush3.bf16.msra.mxu1 %v1266_v4 }
 0x74b   :  { %1010 = vmatprep.subr.bf16.mxu1 %v1203_v0 }
 0x74e   :  { %1011 = vmatpush3.bf16.msra.mxu1 %v1272_v5 }
 0x74f   :  { %1012 = vmatprep.subr.bf16.mxu1 %v1203_v0 }
 0x752   :  { %1013 = vmatpush3.bf16.msra.mxu1 %v1278_v6 }
 0x753   :  { %1014 = vmatprep.subr.bf16.mxu1 %v1203_v0 }
 0x756   :  { %1015 = vmatpush3.bf16.msra.mxu1 %v1284_v7 }
 0x757   :  { %1016 = vmatprep.subr.bf16.mxu1 %v1203_v0 }
 0x75a   :  { %1017 = vmatpush3.bf16.msra.mxu1 %v1290_v8 }
 0x7fd   :  { %v480_v2 = vpop.f32.mrf.mxu1 }
 0x7fe   :  { %v486_v3 = vadd.f32 %v480_v2, %v444_v1  ;;  %v638_v2 = vld [vmem:[#allocation7 + $0x30] sm:$0xff] }
 0x7ff   :  { %v980_v4 = vpop.f32.mrf.mxu1 }
 0x800   :  { %v487_v19 = vmul.f32 0.5, %v486_v3  ;;  %v637_v4 = vld [vmem:[#allocation7 + $0x28] sm:$0xff] }
 0x801   :  { %v483_v20 = vpop.f32.mrf.mxu1 }
 0x802   :  { %v488_v5 = vsel %vm1321_vm3, %v486_v3, %v487_v19  ;;  %v636_v20 = vld [vmem:[#allocation7 + $0x20] sm:$0xff] }
 0x803   :  { %1098 = vtanh.f32 %v488_v5  ;;  %v981_v21 = vpop.f32.mrf.mxu1 }
 0x804   :  { %v635_v21 = vld [vmem:[#allocation7 + $0x18] sm:$0xff] }
 0x810   :  { %v1099_v6 = vpop.eup %1098 }
 0x811   :  { %v490_v22 = vmul.f32 0.5, %v1099_v6 }
 0x813   :  { %v491_v23 = vadd.f32 0.5, %v490_v22  ;;  %v633_v22 = vld [vmem:[#allocation7 + $0x8] sm:$0xff] }
 0x815   :  { %v492_v7 = vsel %vm1321_vm3, %v1099_v6, %v491_v23  ;;  %v634_v6 = vld [vmem:[#allocation7 + $0x10] sm:$0xff] }
 0x816   :  { %495 = vrot.lane.b32.xlu0 %v492_v7, %s1197_s18  ;;  %493 = vrot.lane.b32.xlu1 %v492_v7, %s1207_s2 }
 0x81a   :  { %497 = vrot.lane.b32.xlu1 %v492_v7, %s1206_s0 }
 0x888   :  { %v496_v8 = vpop.permute.xlu0 %495  ;;  %v494_v24 = vpop.permute.xlu1 %493 }
 0x889   :  { %v500_v25 = vmul.f32 %v496_v8, %v492_v7  ;;  %v499_v26 = vmul.f32 %v494_v24, %v439_v13 }
 0x88b   :  { %v501_v27 = vadd.f32 %v500_v25, %v499_v26 }
 0x88c   :  { %v498_v30 = vpop.permute.xlu1 %497 }
 0x88d   :  { %v502_v28 = vsel %vm81_vm4, %v501_v27, 0.0 }
 0x88e   :  { %1100 = vtanh.f32 %v502_v28 }
 0x89b   :  { %v1101_v29 = vpop.eup %1100 }
 0x89c   :  { %v504_v31 = vmul.f32 %v1101_v29, %v498_v30 }
 0x89e   :  { %v766_v32 = vpack.c.bf16 %v504_v31, %v504_v31 }
 0x8a0   :  { %999 = vmatmul.mubr.msk.bf16.vlgmr.msra.gmra.mxu0 %vm1338_vm5, %v766_v32 }
 0x8a1   :  { %1054 = vmatprep.mubr.msk.f32.mxu0 %vm1204_vm0, %v1203_v0  ;;  %1023 = vmatpush3.msra.mxu0 %v647_v56 }
 0x8a2   :  { %1024 = vmatprep.subr.mxu0 %v1203_v0 }
 0x8a3   :  { %1025 = vmatpush3.msra.mxu0 %v646_v57 }
 0x8a4   :  { %1026 = vmatprep.subr.mxu0 %v1203_v0 }
 0x8a5   :  { %1027 = vmatpush3.msra.mxu0 %v645_v58 }
 0x8a6   :  { %1028 = vmatprep.subr.mxu0 %v1203_v0 }
 0x8a7   :  { %1029 = vmatpush3.msra.mxu0 %v644_v59 }
 0x8a8   :  { %1030 = vmatprep.subr.mxu0 %v1203_v0 }
 0x8a9   :  { %1031 = vmatpush3.msra.mxu0 %v643_v60 }
 0x8aa   :  { %1032 = vmatprep.subr.mxu0 %v1203_v0 }
 0x8ab   :  { %1033 = vmatpush3.msra.mxu0 %v642_v14 }
 0x8ac   :  { %1034 = vmatprep.subr.mxu0 %v1203_v0 }
 0x8ad   :  { %1035 = vmatpush3.msra.mxu0 %v641_v16 }
 0x8ae   :  { %1036 = vmatprep.subr.mxu0 %v1203_v0 }
 0x8af   :  { %1037 = vmatpush3.msra.mxu0 %v640_v17 }
 0x8b0   :  { %1038 = vmatprep.subr.mxu0 %v1203_v0 }
 0x8b1   :  { %1039 = vmatpush3.msra.mxu0 %v639_v18 }
 0x8b2   :  { %1040 = vmatprep.subr.mxu0 %v1203_v0 }
 0x8b3   :  { %1041 = vmatpush3.msra.mxu0 %v638_v2 }
 0x8b4   :  { %1042 = vmatprep.subr.mxu0 %v1203_v0 }
 0x8b5   :  { %1043 = vmatpush3.msra.mxu0 %v637_v4 }
 0x8b6   :  { %1044 = vmatprep.subr.mxu0 %v1203_v0 }
 0x8b7   :  { %1045 = vmatpush3.msra.mxu0 %v636_v20 }
 0x8b8   :  { %1046 = vmatprep.subr.mxu0 %v1203_v0 }
 0x8b9   :  { %1047 = vmatpush3.msra.mxu0 %v635_v21 }
 0x8ba   :  { %1048 = vmatprep.subr.mxu0 %v1203_v0 }
 0x8bb   :  { %1049 = vmatpush3.msra.mxu0 %v634_v6 }
 0x8bc   :  { %1050 = vmatprep.subr.mxu0 %v1203_v0 }
 0x8bd   :  { %1051 = vmatpush3.msra.mxu0 %v633_v22 }
 0x8be   :  { %1052 = vmatprep.subr.mxu0 %v1203_v0  ;;  %v771_v0 = vld [vmem:[%s1540_s3] ss:$0 sm:$0xff] }
 0x8bf   :  { %1053 = vmatpush3.msra.mxu0 %v632_v15 }
 0x960   :  { %v543_v35 = vpop.f32.mrf.mxu0 }
 0x961   :  { %v549_v36 = vadd.f32 %v543_v35, %v507_v33 }
 0x962   :  { %v1000_v37 = vpop.f32.mrf.mxu0 }
 0x963   :  { %v550_v38 = vmul.f32 0.5, %v549_v36 }
 0x964   :  { %v546_v39 = vpop.f32.mrf.mxu0 }
 0x965   :  { %v551_v40 = vsel %vm1321_vm3, %v549_v36, %v550_v38 }
 0x966   :  { %1102 = vtanh.f32 %v551_v40  ;;  %v1001_v41 = vpop.f32.mrf.mxu0 }
 0x973   :  { %v1103_v42 = vpop.eup %1102 }
 0x974   :  { %v553_v43 = vmul.f32 0.5, %v1103_v42 }
 0x976   :  { %v554_v44 = vadd.f32 0.5, %v553_v43 }
 0x978   :  { %v555_v45 = vsel %vm1321_vm3, %v1103_v42, %v554_v44 }
 0x979   :  { %558 = vrot.lane.b32.xlu1 %v555_v45, %s1197_s18  ;;  %556 = vrot.lane.b32.xlu0 %v555_v45, %s1207_s2 }
 0x97d   :  { %560 = vrot.lane.b32.xlu0 %v555_v45, %s1206_s0 }
 0x9eb   :  { %v559_v46 = vpop.permute.xlu1 %558  ;;  %v557_v47 = vpop.permute.xlu0 %556 }
 0x9ec   :  { %v563_v48 = vmul.f32 %v559_v46, %v555_v45  ;;  %v562_v49 = vmul.f32 %v557_v47, %v502_v28 }
 0x9ee   :  { %v564_v50 = vadd.f32 %v563_v48, %v562_v49 }
 0x9ef   :  { %v561_v53 = vpop.permute.xlu0 %560 }
 0x9f0   :  { %v1499_v51 = vsel %vm81_vm4, %v564_v50, 0.0 }
 0x9f1   :  { %1104 = vtanh.f32 %v1499_v51 }
 0x9fe   :  { %v1105_v52 = vpop.eup %1104 }
 0x9ff   :  { %v567_v54 = vmul.f32 %v1105_v52, %v561_v53 }
 0xa01   :  { %v769_v55 = vpack.c.bf16 %v567_v54, %v567_v54 }
 0xa03   :  { %1019 = vmatmul.mubr.msk.bf16.vlgmr.msra.gmra.mxu1 %vm1338_vm5, %v769_v55 }
 0xac3   :  { %v606_v61 = vpop.f32.mrf.mxu1 }
 0xac4   :  { %v612_v62 = vadd.f32 %v606_v61, %v570_v34 }
 0xac5   :  { %v1020_v63 = vpop.f32.mrf.mxu1 }
 0xac6   :  { %v613_v9 = vmul.f32 0.5, %v612_v62 }
 0xac7   :  { %v609_v10 = vpop.f32.mrf.mxu1 }
 0xac8   :  { %v614_v12 = vsel %vm1321_vm3, %v612_v62, %v613_v9 }
 0xac9   :  { %1106 = vtanh.f32 %v614_v12  ;;  %v1021_v13 = vpop.f32.mrf.mxu1 }
 0xad6   :  { %v1107_v1 = vpop.eup %1106 }
 0xad7   :  { %v616_v3 = vmul.f32 0.5, %v1107_v1 }
 0xad9   :  { %v617_v19 = vadd.f32 0.5, %v616_v3 }
 0xadb   :  { %v618_v5 = vsel %vm1321_vm3, %v1107_v1, %v617_v19 }
 0xadc   :  { %621 = vrot.lane.b32.xlu0 %v618_v5, %s1197_s18  ;;  %619 = vrot.lane.b32.xlu1 %v618_v5, %s1207_s2 }
 0xae0   :  { %623 = vrot.lane.b32.xlu1 %v618_v5, %s1206_s0 }
 0xb4e   :  { %v622_v23 = vpop.permute.xlu0 %621  ;;  %v620_v7 = vpop.permute.xlu1 %619 }
 0xb4f   :  { %v626_v8 = vmul.f32 %v622_v23, %v618_v5  ;;  %v625_v24 = vmul.f32 %v620_v7, %v1499_v51 }
 0xb51   :  { %v627_v25 = vadd.f32 %v626_v8, %v625_v24 }
 0xb52   :  { %v624_v28 = vpop.permute.xlu1 %623 }
 0xb53   :  { %v628_v26 = vsel %vm81_vm4, %v627_v25, 0.0 }
 0xb54   :  { %1108 = vtanh.f32 %v628_v26 }
 0xb61   :  { %v1109_v27 = vpop.eup %1108 }
 0xb62   :  { %v630_v29 = vmul.f32 %v1109_v27, %v624_v28 }
 0xb64   :  { %1055 = vmatmul.mubr.msk.f32.vlgmr.msra.gmra.mxu0 %vm81_vm4, %v630_v29 }
 0xc24   :  { %v721_v30 = vpop.f32.mrf.mxu0 }
 0xc25   :  { %v722_v31 = vadd.f32 %v771_v0, %v721_v30 }
 0xc26   :  { %v1056_v32 = vpop.f32.mrf.mxu0 }
 0xc27   :  { %725 = vst [vmem:[#allocation8] sm:$0xff] %v722_v31 }
 0xc28   :  { %1181 = shalt.err (!%p1178_p5)
}
 0xc29   :  { %735 = dma.vmem_to_hbm [thread:$0]  %s733_s10, 128, %s1541_s4, [#allocation4]  }
 0xc2a   :  { %1194 = dma.done.wait [#allocation4], 128  }
 0xc2b   :  { %1195 = vsyncadd [#allocation4], 4294967168 }
 0xc2c   :  { %739 = vsyncpa [#allocation3], 1 }
 0xc2d   :  { %740 = vsyncpa [#allocation6], 1 }
 0xc2e   :  { %741 = vsyncpa [#allocation4], 1 }

</bundles_post_ra>
